<compile_context>
chip_gen: v6e
topology: v6e:2x2x1
jax: 0.10.0
libtpu: 0.0.40
codegen_flags: <defaults>
</compile_context>

<pallas_src>
import functools
import jax
import jax.numpy as jnp
from jax.experimental import pallas as pl
from jax.experimental.pallas import tpu as pltpu

BN_EPS = 1e-5


def _round_up(x, m):
    return (x + m - 1) // m * m


def _vmem_budget_bytes():
    """~75% of the real per-core VMEM capacity (generation-aware)."""
    cap = 64 * 2**20                      # conservative fallback == v7x per-core VMEM
    try:
        cap = int(pltpu.get_tpu_info().vmem_capacity_bytes)   # 128 MiB v5e/v6e, 64 MiB v7x
    except Exception:
        pass
    return int(cap) * 3 // 4


def _conv1_bn_relu_kernel(x_ref, w_ref, b_ref, o_ref):
    # x_ref: (bn, Cin, thw)  f32  -- bn batch elements, one lane-dense spatial tile
    # w_ref: (Cout, Cin)     f32  -- conv weight with BN scale folded in (grid-invariant)
    # b_ref: (Cout, 1)       f32  -- conv bias + BN shift, folded (grid-invariant)
    # o_ref: (bn, Cout, thw) out_dtype
    w = w_ref[...]
    b = b_ref[...]
    for i in range(x_ref.shape[0]):                           # static unroll over batch block
        y = jnp.dot(w, x_ref[i], preferred_element_type=jnp.float32)   # MXU
        o_ref[i] = jnp.maximum(y + b, 0.0).astype(o_ref.dtype)         # fused bias + ReLU


def conv1block_forward(x, weight, conv_bias, gamma, beta, running_mean,
                       running_var, *, out_dtype=jnp.float32):
    """Conv1Block forward: 1x1 Conv2d + BatchNorm2d (inference) + ReLU.

    x:        (N, Cin, H, W) float32, NCHW (PyTorch layout)
    weight:   (Cout, Cin, 1, 1) float32
    conv_bias, gamma, beta, running_mean, running_var: (Cout,) float32
    returns:  (N, Cout, H, W) in `out_dtype` (f32 default; bf16 halves store traffic)
    """
    N, Cin, H, W = x.shape
    Cout = weight.shape[0]
    HW = H * W

    # ---- fold BatchNorm (inference running stats) into conv weight / bias ----
    scale = gamma / jnp.sqrt(running_var + BN_EPS)                # (Cout,)
    w2d = (weight.reshape(Cout, Cin) * scale[:, None]).astype(jnp.float32)
    bias = (beta + scale * (conv_bias - running_mean)).reshape(Cout, 1).astype(jnp.float32)

    # ---- VMEM-budget-driven tiling (no channel padding: full-dim channel blocks) ----
    x_bytes = jnp.dtype(x.dtype).itemsize
    out_bytes = jnp.dtype(out_dtype).itemsize
    budget = _vmem_budget_bytes()
    fixed = 2 * (Cout * Cin * 4 + Cout * 4)            # weight+bias, double-buffered
    per_col = 2 * (Cin * x_bytes + Cout * out_bytes)   # per spatial column, double-buffered
    avail = max(budget - fixed, per_col * 128)
    max_cols = int(min(8192, max(128, avail // per_col)))

    # spatial tile: prefer zero padding (full extent, or an exact 128-multiple divisor)
    if HW <= max_cols:
        thw, hw_p = HW, HW
    else:
        thw = 0
        t = (max_cols // 128) * 128
        while t >= 128:
            if HW % t == 0:
                thw = t
                break
            t -= 128
        if thw:
            hw_p = HW
        else:                                          # ragged fallback: pad the tail tile
            thw = max(128, (max_cols // 128) * 128)
            hw_p = _round_up(HW, thw)
    n_hw = hw_p // thw

    # batch blocking: fatten tiny steps, but keep >=2 grid steps (v7x megacore)
    bn = 1
    if n_hw == 1 and N > 1:
        bn_cap = min(N // 2, 8, max(1, int(avail // (per_col * thw))))
        for cand in range(bn_cap, 0, -1):
            if N % cand == 0:
                bn = cand
                break
    # if everything collapsed to a single step, split the spatial axis in two
    if (N // bn) * n_hw < 2 and thw % 256 == 0:
        thw //= 2
        n_hw = hw_p // thw

    # ---- free reshapes only; spatial pad only in the ragged fallback ----
    x3 = x.reshape(N, Cin, HW)
    if hw_p != HW:
        x3 = jnp.pad(x3, ((0, 0), (0, 0), (0, hw_p - HW)))

    vmem_limit = int(max(32 * 2**20, min(budget, 100 * 2**20)))

    out = pl.pallas_call(
        _conv1_bn_relu_kernel,
        out_shape=jax.ShapeDtypeStruct((N, Cout, hw_p), out_dtype),
        grid=(N // bn, n_hw),
        in_specs=[
            pl.BlockSpec((bn, Cin, thw), lambda n, t: (n, 0, t)),
            pl.BlockSpec((Cout, Cin), lambda n, t: (0, 0)),
            pl.BlockSpec((Cout, 1), lambda n, t: (0, 0)),
        ],
        out_specs=pl.BlockSpec((bn, Cout, thw), lambda n, t: (n, 0, t)),
        compiler_params=pltpu.CompilerParams(
            dimension_semantics=("parallel", "parallel"),
            vmem_limit_bytes=vmem_limit,
        ),
    )(x3, w2d, bias)

    if hw_p != HW:                                     # only the ragged fallback slices
        out = out[:, :, :HW]
    return out.reshape(N, Cout, H, W)


if __name__ == "__main__":
    key = jax.random.PRNGKey(0)
    kx, kw, kb, kg, kbe, km, kv = jax.random.split(key, 7)

    N, Cin, Cout, Hsz, Wsz = 2, 4, 8, 16, 16
    x = jax.random.normal(kx, (N, Cin, Hsz, Wsz), jnp.float32)
    weight = 0.2 * jax.random.normal(kw, (Cout, Cin, 1, 1), jnp.float32)
    conv_bias = 0.1 * jax.random.normal(kb, (Cout,), jnp.float32)
    gamma = 1.0 + 0.1 * jax.random.normal(kg, (Cout,), jnp.float32)
    beta = 0.1 * jax.random.normal(kbe, (Cout,), jnp.float32)
    running_mean = 0.1 * jax.random.normal(km, (Cout,), jnp.float32)
    running_var = 1.0 + 0.5 * jax.random.uniform(kv, (Cout,), jnp.float32)

    fwd = jax.jit(functools.partial(
        conv1block_forward, weight=weight, conv_bias=conv_bias, gamma=gamma,
        beta=beta, running_mean=running_mean, running_var=running_var))
    out = jax.block_until_ready(fwd(x))

    assert out.shape == (N, Cout, Hsz, Wsz), out.shape
    assert bool(jnp.all(jnp.isfinite(out)))
    assert float(jnp.min(out)) >= 0.0                  # ReLU really applied

    # true f32 reference (highest-precision einsum); tolerance is loose enough to
    # absorb MXU contract-precision differences while still catching any real
    # folding/indexing/tiling bug (those produce O(0.1..1) errors).
    scale = gamma / jnp.sqrt(running_var + BN_EPS)
    w_ref = weight.reshape(Cout, Cin) * scale[:, None]
    b_ref = beta + scale * (conv_bias - running_mean)
    ref = jnp.einsum('oc,nchw->nohw', w_ref, x,
                     precision=jax.lax.Precision.HIGHEST) + b_ref[None, :, None, None]
    ref = jnp.maximum(ref, 0.0)
    assert bool(jnp.allclose(out, ref, atol=2e-2, rtol=2e-2)), \
        float(jnp.max(jnp.abs(out - ref)))

    print("KERNEL_OK")
</pallas_src>

<mosaic_0001>
module attributes {stable_mosaic.version = 11 : i64} {
  func.func @_conv1_bn_relu_kernel(%arg0: i32, %arg1: i32, %arg2: memref<1x4x256xf32, #tpu.memory_space<vmem>>, %arg3: memref<8x4xf32, #tpu.memory_space<vmem>>, %arg4: memref<8x1xf32, #tpu.memory_space<vmem>>, %arg5: memref<1x8x256xf32, #tpu.memory_space<vmem>>) attributes {dimension_semantics = [#tpu.dimension_semantics<parallel>, #tpu.dimension_semantics<parallel>], iteration_bounds = array<i64: 2, 1>, scalar_prefetch = 0 : i64, scratch_operands = 0 : i64, tpu.core_type = #tpu.core_type<tc>, window_params = [{transform_indices = @transform_0, window_bounds = array<i64: 1, 4, 256>}, {pipeline_mode = #tpu.pipeline_mode<synchronous>, transform_indices = @transform_1, window_bounds = array<i64: 8, 4>}, {pipeline_mode = #tpu.pipeline_mode<synchronous>, transform_indices = @transform_2, window_bounds = array<i64: 8, 1>}, {transform_indices = @transform_3, window_bounds = array<i64: 1, 8, 256>}]} {
    %c0 = arith.constant 0 : index
    %c0_0 = arith.constant 0 : index
    %0 = vector.load %arg3[%c0, %c0_0] : memref<8x4xf32, #tpu.memory_space<vmem>>, vector<8x4xf32>
    %c0_1 = arith.constant 0 : index
    %c0_2 = arith.constant 0 : index
    %1 = vector.load %arg4[%c0_1, %c0_2] : memref<8x1xf32, #tpu.memory_space<vmem>>, vector<8x1xf32>
    %c0_3 = arith.constant 0 : index
    %c0_4 = arith.constant 0 : index
    %c0_5 = arith.constant 0 : index
    %2 = vector.load %arg2[%c0_3, %c0_4, %c0_5] : memref<1x4x256xf32, #tpu.memory_space<vmem>>, vector<1x4x256xf32>
    %3 = vector.shape_cast %2 : vector<1x4x256xf32> to vector<4x256xf32>
    %cst = arith.constant dense<0.000000e+00> : vector<8x256xf32>
    %4 = tpu.matmul %0, %3, %cst {dimension_numbers = #tpu.dot_dimension_numbers<[1], [0], [0], [1], [0, 0, 1, 1], [], []>} : vector<8x4xf32>, vector<4x256xf32>, vector<8x256xf32> -> vector<8x256xf32>
    %5 = vector.broadcast %1 : vector<8x1xf32> to vector<8x256xf32>
    %6 = arith.addf %4, %5 : vector<8x256xf32>
    %cst_6 = arith.constant 0.000000e+00 : f32
    %7 = vector.broadcast %cst_6 : f32 to vector<8x256xf32>
    %8 = arith.maximumf %6, %7 : vector<8x256xf32>
    %c0_7 = arith.constant 0 : index
    %c0_8 = arith.constant 0 : index
    %c0_9 = arith.constant 0 : index
    %9 = vector.load %arg5[%c0_7, %c0_8, %c0_9] : memref<1x8x256xf32, #tpu.memory_space<vmem>>, vector<1x8x256xf32>
    %10 = vector.shape_cast %9 : vector<1x8x256xf32> to vector<8x256xf32>
    %11 = vector.shape_cast %8 : vector<8x256xf32> to vector<1x8x256xf32>
    tpu.vector_store %arg5[%c0_7, %c0_8, %c0_9], %11 {strides = array<i32>} : memref<1x8x256xf32, #tpu.memory_space<vmem>>, vector<1x8x256xf32>,
    return
  }
  func.func @transform_0(%arg0: i32, %arg1: i32) -> (i32, i32, i32) {
    %c0_i32 = arith.constant 0 : i32
    %c0_i32_0 = arith.constant 0 : i32
    return %arg0, %c0_i32, %arg1 : i32, i32, i32
  }
  func.func @transform_1(%arg0: i32, %arg1: i32) -> (i32, i32) {
    %c0_i32 = arith.constant 0 : i32
    %c0_i32_0 = arith.constant 0 : i32
    %c0_i32_1 = arith.constant 0 : i32
    return %c0_i32, %c0_i32_0 : i32, i32
  }
  func.func @transform_2(%arg0: i32, %arg1: i32) -> (i32, i32) {
    %c0_i32 = arith.constant 0 : i32
    %c0_i32_0 = arith.constant 0 : i32
    %c0_i32_1 = arith.constant 0 : i32
    return %c0_i32, %c0_i32_0 : i32, i32
  }
  func.func @transform_3(%arg0: i32, %arg1: i32) -> (i32, i32, i32) {
    %c0_i32 = arith.constant 0 : i32
    %c0_i32_0 = arith.constant 0 : i32
    return %arg0, %c0_i32, %arg1 : i32, i32, i32
  }
}

</mosaic_0001>

<bundles_post_ra>
// kernel: conv1block_forward.1
= control target key start
LH: loop header
LB: loop body
LE: loop exit
PB: predicated region body
PF: predicated region fallthrough
CT: control target
= control target key end

     0   :  { %s481_s12 = smov 0   ;;  %s483_s13 = smov 0   ;;  %s520_s0 = inlined_call_operand.vmem [shape: f32[2,4,256], index: 0, kind: input, shape index: {}]   ;;  %s521_s1 = inlined_call_operand.vmem [shape: f32[8,4], index: 1, kind: input, shape index: {}]   ;;  %s522_s2 = inlined_call_operand.vmem [shape: f32[8,1], index: 2, kind: input, shape index: {}]   ;;  %s523_s3 = inlined_call_operand.vmem [shape: f32[2,8,256], index: 3, kind: output, shape index: {}]  }
   0x1   :  { %s485_s14 = smov 0  }
   0x2 LB: > { %s25_s15 = sadd.s32 1, %s453_s13  ;;  %p395_p0 = scmp.ge.s32.totalorder %s457_s14, 1  ;;  %s457_s14 = sphi %s485_s14, %s13_s14   ;;  %s453_s13 = sphi %s483_s13, %s525_s13   ;;  %s449_s12 = sphi %s481_s12, %s524_s12  }
   0x3   : > { %p27_p1 = scmp.ge.s32.totalorder %s25_s15, 2  ;;  %p158_p2 = scmp.lt.s32.totalorder %s457_s14, 3 }
   0x5   : > { %s527_s15 = smov (%p27_p1, %s25_s15), 0  ;;  %p159_p3 = pnand %p395_p0, %p158_p2 }
   0x6   : > { %p191_p4 = scmp.lt.s32.totalorder (!%p159_p3), %s449_s12, 1 }
   0x7   : > { %162 = sbr.rel (%p159_p3) target bundleno = 220 (0xdc), region = 32 }
   0xc   : > { %v459_v0 = vmov 0.0   ;;  %v460_v1 = vmov 0   ;;  %v211_v2 = vld [vmem:[%s522_s2] sm:$0xff]  ;;  %s529_s12 = smov (!%p191_p4, %s449_s12), 1  ;;  %vm224_vm0 = vcmask 1043456   ;;  %vm220_vm1 = vcmask 31744  }
   0xd   : > { %293 = vmatprep.mubr.f32.mxu0 %v459_v0  ;;  %433 = vset.pattern.permute.xlu0 %v460_v1  ;;  %s405_s18 = sshll.u32 %s529_s12, 3  ;;  %v210_v5 = vld [vmem:[%s521_s1] sm:$0xff]  ;;  %s406_s24 = sshll.u32 %s529_s12, 4 }
   0xe   : > { %215 = vperm.xlu0 %433, %v211_v2   ;;  %s198_s21 = scalar_lea.vmem %s520_s0, %s405_s18  ;;  %s208_s27 = scalar_lea.vmem %s523_s3, %s406_s24 }
   0xf   : > { %v212_v3 = vld [vmem:[%s198_s21] sm:$0xff] }
  0x10   : > { %v219_v4 = vcombine.high %v212_v3, %v212_v3 }
  0x12   : > { %400 = vmatprep.subr.msk.mxu0 %vm224_vm0, %v219_v4 }
  0x13   : > { %401 = vmatpush1.msk.msra.mxu0 %vm224_vm0, %v212_v3 }
  0x14   : > { %402 = vmatmul.mubr.msk.f32.vlgmr.msra.gmra.mxu0 %vm220_vm1, %v210_v5 }
  0x89   : > { %v216_v6 = vpop.permute.xlu0 %215 }
  0xd4   : > { %v295_v7 = vpop.f32.mrf.mxu0 }
  0xd5   : > { %v296_v8 = vadd.f32 %v295_v7, %v216_v6 }
  0xd6   : > { %v297_v9 = vpop.f32.mrf.mxu0 }
  0xd7   : > { %v300_v10 = vmax.f32 %v296_v8, 0.0  ;;  %v298_v11 = vadd.f32 %v297_v9, %v216_v6 }
  0xd9   : > { %302 = vst [vmem:[%s208_s27] sm:$0xff] %v300_v10  ;;  %v301_v12 = vmax.f32 %v298_v11, 0.0 }
  0xdb   : > { %303 = vst [vmem:[%s208_s27 + $0x8] sm:$0xff] %v301_v12 }
  0xdc PF: > { %s13_s14 = sadd.s32 1, %s457_s14   ;;  %s524_s12 = smov %s453_s13 }
  0xdd   : > { %p10_p5 = scmp.ge.s32.totalorder %s13_s14, 4   ;;  %s525_s13 = smov %s527_s15 }
  0xdf   :  { %12 = sbr.rel (!%p10_p5) target bundleno = 2 (0x2), region = 62 }

</bundles_post_ra>
